<compile_context>
chip_gen: v5e
topology: v5e:2x2
jax: 0.10.0
libtpu: 0.0.40
codegen_flags: <defaults>
</compile_context>

<pallas_src>
import jax
import jax.numpy as jnp
from jax.experimental import pallas as pl
from jax.experimental.pallas import tpu as pltpu

_LANE = 128                    # vreg lane width
_SUBLANE = 8                   # vreg sublanes
_TILE_BYTES = 2 * 1024 * 1024  # ~2 MiB per (double-buffered) input tile
_CHUNK_ROWS = 256              # 256 x 128 f32 = 32 vregs live per chunk
_NUM_CORES = 2                 # v7x: 2 TCs; harmless serial split on v5e/v6e


def _make_sum_kernel(tile_rows: int, chunk_rows: int, rows: int,
                     blocks_per_core: int, needs_mask: bool):
    """Per-core partial reduction: o[p] = (8,128) f32 vector partial sum."""
    num_chunks = tile_rows // chunk_rows

    def kernel(x_ref, o_ref):
        p = pl.program_id(0)
        j = pl.program_id(1)

        @pl.when(j == 0)
        def _init():
            o_ref[...] = jnp.zeros_like(o_ref)

        blk = p * blocks_per_core + j

        def accum_chunk(start, masked):
            # Cast-on-load: input streams in its native dtype (bf16-friendly).
            x = x_ref[pl.ds(start, chunk_rows), :].astype(jnp.float32)
            if masked:
                # Rows past `rows` are padding / phantom-block data: zero them.
                row_ids = (blk * tile_rows + start +
                           jax.lax.broadcasted_iota(jnp.int32, (chunk_rows, 1), 0))
                x = jnp.where(row_ids < rows, x, 0.0)
            # Pure-VPU accumulation: fold the chunk's (8,128) sub-tiles.
            o_ref[...] += jnp.sum(
                x.reshape(chunk_rows // _SUBLANE, _SUBLANE, _LANE), axis=0)

        def run(masked):
            if num_chunks == 1:
                accum_chunk(0, masked)
            else:
                def body(c, carry):
                    accum_chunk(pl.multiple_of(c * chunk_rows, _SUBLANE), masked)
                    return carry
                jax.lax.fori_loop(0, num_chunks, body, 0)

        if needs_mask:
            # Only the last real block (partial) or phantom blocks need masking.
            ragged = (blk + 1) * tile_rows > rows

            @pl.when(jnp.logical_not(ragged))
            def _interior():
                run(False)

            @pl.when(ragged)
            def _edge():
                run(True)
        else:
            run(False)

    return kernel


def _pallas_block_sum(x2d, rows: int):
    """float32 sum of x2d[:rows, :] via a 2-core, chunked Pallas reduction."""
    itemsize = jnp.dtype(x2d.dtype).itemsize
    # ~2 MiB of native-dtype traffic per tile; always a multiple of _CHUNK_ROWS.
    target_rows = max(_CHUNK_ROWS, _TILE_BYTES // (_LANE * itemsize))

    rows8 = (rows // _SUBLANE) * _SUBLANE
    if rows8 >= _CHUNK_ROWS:
        tile_rows = min(target_rows, (rows8 // _CHUNK_ROWS) * _CHUNK_ROWS)
        chunk_rows = _CHUNK_ROWS
    else:
        tile_rows = rows8
        chunk_rows = rows8

    num_blocks = pl.cdiv(rows, tile_rows)
    blocks_per_core = pl.cdiv(num_blocks, _NUM_CORES)
    has_phantom = _NUM_CORES * blocks_per_core > num_blocks
    needs_mask = (rows % tile_rows != 0) or has_phantom

    kernel = _make_sum_kernel(tile_rows, chunk_rows, rows,
                              blocks_per_core, needs_mask)

    partials = pl.pallas_call(
        kernel,
        out_shape=jax.ShapeDtypeStruct((_NUM_CORES * _SUBLANE, _LANE),
                                       jnp.float32),
        grid_spec=pltpu.PrefetchScalarGridSpec(
            num_scalar_prefetch=0,
            grid=(_NUM_CORES, blocks_per_core),
            in_specs=[pl.BlockSpec(
                (tile_rows, _LANE),
                # Clamp phantom blocks to the last real block (data re-read is
                # harmless; the in-kernel mask zeroes its contribution).
                lambda p, j, bpc=blocks_per_core, nb=num_blocks:
                    (jnp.minimum(p * bpc + j, nb - 1), 0))],
            out_specs=pl.BlockSpec((_SUBLANE, _LANE), lambda p, j: (p, 0)),
        ),
        compiler_params=pltpu.CompilerParams(
            dimension_semantics=("parallel", "arbitrary")),
    )(x2d)

    return jnp.sum(partials)


def loss_forward(x_fake, reg=1.0, transform=lambda x: x, norm_foo=lambda x: x):
    """reg * mean(compute(x_fake)) with compute == identity (abstract base)."""
    # TODO(synk): Loss.compute() raises NotImplementedError in the reference;
    #             the identity is used as the component-wise loss.
    x = norm_foo(transform(x_fake))
    n_valid = x.size
    reg_f = jnp.asarray(reg, jnp.float32)

    if n_valid == 0:
        return reg_f * jnp.float32(jnp.nan)  # torch mean of empty tensor is nan

    scale = reg_f / jnp.float32(n_valid)

    flat = x.reshape(-1)
    rows = flat.size // _LANE
    tail = flat.size - rows * _LANE

    # Lane-ragged remainder (< 128 elements): plain jnp.sum, no full-tensor pad.
    tail_sum = (jnp.sum(flat[rows * _LANE:].astype(jnp.float32))
                if tail else jnp.float32(0.0))

    if rows < _SUBLANE:
        # Tiny input (< 1024 elements): not worth a kernel launch.
        body_sum = (jnp.sum(flat[:rows * _LANE].astype(jnp.float32))
                    if rows else jnp.float32(0.0))
        return scale * (body_sum + tail_sum)

    if tail:
        # TODO(synk): the prefix slice may cost one extra copy for lane-ragged N.
        x2d = flat[:rows * _LANE].reshape(rows, _LANE)
    else:
        x2d = flat.reshape(rows, _LANE)  # contiguous reshape: free metadata op

    return scale * (_pallas_block_sum(x2d, rows) + tail_sum)


if __name__ == "__main__":
    key = jax.random.PRNGKey(0)
    # Small NCHW conv-style input consistent with the module's usage.
    x_fake = jax.random.normal(key, (2, 4, 16, 16), dtype=jnp.float32)

    reg = 1.0
    result = loss_forward(x_fake, reg=reg)
    result = jax.block_until_ready(result)

    # Sanity check against the pure-JAX reference of the forward semantics.
    ref = reg * jnp.mean(x_fake)
    assert jnp.allclose(result, ref, atol=1e-5, rtol=1e-5), (result, ref)

    print("KERNEL_OK")
</pallas_src>

<mosaic_0001>
module attributes {stable_mosaic.version = 11 : i64} {
  func.func @kernel(%arg0: i32, %arg1: i32, %arg2: memref<16x128xf32, #tpu.memory_space<vmem>>, %arg3: memref<8x128xf32, #tpu.memory_space<vmem>>) attributes {dimension_semantics = [#tpu.dimension_semantics<parallel>, #tpu.dimension_semantics<arbitrary>], iteration_bounds = array<i64: 2, 1>, scalar_prefetch = 0 : i64, scratch_operands = 0 : i64, tpu.core_type = #tpu.core_type<tc>, window_params = [{transform_indices = @transform_0, window_bounds = array<i64: 16, 128>}, {transform_indices = @transform_1, window_bounds = array<i64: 8, 128>}]} {
    %c0_i32 = arith.constant 0 : i32
    %0 = arith.cmpi eq, %arg1, %c0_i32 : i32
    %1 = arith.extui %0 : i1 to i32
    %c0_i32_0 = arith.constant 0 : i32
    %2 = arith.cmpi ne, %1, %c0_i32_0 : i32
    scf.if %2 {
      %cst = arith.constant 0.000000e+00 : f32
      %13 = vector.broadcast %cst : f32 to vector<8x128xf32>
      %c0 = arith.constant 0 : index
      %c0_5 = arith.constant 0 : index
      %14 = vector.load %arg3[%c0, %c0_5] : memref<8x128xf32, #tpu.memory_space<vmem>>, vector<8x128xf32>
      tpu.vector_store %arg3[%c0, %c0_5], %13 {strides = array<i32>} : memref<8x128xf32, #tpu.memory_space<vmem>>, vector<8x128xf32>,
    } else {
    }
    %c1_i32 = arith.constant 1 : i32
    %3 = arith.muli %arg0, %c1_i32 : i32
    %4 = arith.addi %3, %arg1 : i32
    %c1_i32_1 = arith.constant 1 : i32
    %5 = arith.addi %4, %c1_i32_1 : i32
    %c16_i32 = arith.constant 16 : i32
    %6 = arith.muli %5, %c16_i32 : i32
    %c16_i32_2 = arith.constant 16 : i32
    %7 = arith.cmpi sgt, %6, %c16_i32_2 : i32
    %true = arith.constant true
    %8 = arith.xori %7, %true : i1
    %9 = arith.extui %8 : i1 to i32
    %c0_i32_3 = arith.constant 0 : i32
    %10 = arith.cmpi ne, %9, %c0_i32_3 : i32
    scf.if %10 {
      %c0 = arith.constant 0 : index
      %c0_5 = arith.constant 0 : index
      %13 = vector.load %arg2[%c0, %c0_5] : memref<16x128xf32, #tpu.memory_space<vmem>>, vector<16x128xf32>
      %c0_6 = arith.constant 0 : index
      %c0_7 = arith.constant 0 : index
      %14 = vector.load %arg3[%c0_6, %c0_7] : memref<8x128xf32, #tpu.memory_space<vmem>>, vector<8x128xf32>
      %15 = vector.shape_cast %13 : vector<16x128xf32> to vector<2x8x128xf32>
      %cst = arith.constant dense<0.000000e+00> : vector<8x128xf32>
      %16 = vector.multi_reduction <add>, %15, %cst [0] : vector<2x8x128xf32> to vector<8x128xf32>
      %17 = arith.addf %14, %16 : vector<8x128xf32>
      %c0_8 = arith.constant 0 : index
      %c0_9 = arith.constant 0 : index
      %18 = vector.load %arg3[%c0_8, %c0_9] : memref<8x128xf32, #tpu.memory_space<vmem>>, vector<8x128xf32>
      tpu.vector_store %arg3[%c0_8, %c0_9], %17 {strides = array<i32>} : memref<8x128xf32, #tpu.memory_space<vmem>>, vector<8x128xf32>,
    } else {
    }
    %11 = arith.extui %7 : i1 to i32
    %c0_i32_4 = arith.constant 0 : i32
    %12 = arith.cmpi ne, %11, %c0_i32_4 : i32
    scf.if %12 {
      %c0 = arith.constant 0 : index
      %c0_5 = arith.constant 0 : index
      %13 = vector.load %arg2[%c0, %c0_5] : memref<16x128xf32, #tpu.memory_space<vmem>>, vector<16x128xf32>
      %c16_i32_6 = arith.constant 16 : i32
      %14 = arith.muli %4, %c16_i32_6 : i32
      %c0_i32_7 = arith.constant 0 : i32
      %15 = arith.addi %14, %c0_i32_7 : i32
      %16 = tpu.iota {dimensions = array<i32: 0>} : vector<16x1xi32>
      %17 = vector.broadcast %15 : i32 to vector<16x1xi32>
      %18 = arith.addi %17, %16 : vector<16x1xi32>
      %c16_i32_8 = arith.constant 16 : i32
      %19 = vector.broadcast %c16_i32_8 : i32 to vector<16x1xi32>
      %20 = arith.cmpi slt, %18, %19 : vector<16x1xi32>
      %cst = arith.constant 0.000000e+00 : f32
      %21 = vector.shape_cast %20 : vector<16x1xi1> to vector<16x1xi1>
      %22 = vector.broadcast %21 : vector<16x1xi1> to vector<16x128xi1>
      %23 = vector.broadcast %cst : f32 to vector<16x128xf32>
      %24 = arith.select %22, %13, %23 : vector<16x128xi1>, vector<16x128xf32>
      %c0_9 = arith.constant 0 : index
      %c0_10 = arith.constant 0 : index
      %25 = vector.load %arg3[%c0_9, %c0_10] : memref<8x128xf32, #tpu.memory_space<vmem>>, vector<8x128xf32>
      %26 = vector.shape_cast %24 : vector<16x128xf32> to vector<2x8x128xf32>
      %cst_11 = arith.constant dense<0.000000e+00> : vector<8x128xf32>
      %27 = vector.multi_reduction <add>, %26, %cst_11 [0] : vector<2x8x128xf32> to vector<8x128xf32>
      %28 = arith.addf %25, %27 : vector<8x128xf32>
      %c0_12 = arith.constant 0 : index
      %c0_13 = arith.constant 0 : index
      %29 = vector.load %arg3[%c0_12, %c0_13] : memref<8x128xf32, #tpu.memory_space<vmem>>, vector<8x128xf32>
      tpu.vector_store %arg3[%c0_12, %c0_13], %28 {strides = array<i32>} : memref<8x128xf32, #tpu.memory_space<vmem>>, vector<8x128xf32>,
    } else {
    }
    return
  }
  func.func @transform_0(%arg0: i32, %arg1: i32) -> (i32, i32) {
    %c1_i32 = arith.constant 1 : i32
    %0 = arith.muli %arg0, %c1_i32 : i32
    %1 = arith.addi %0, %arg1 : i32
    %c0_i32 = arith.constant 0 : i32
    %2 = arith.minsi %1, %c0_i32 : i32
    %c0_i32_0 = arith.constant 0 : i32
    %c0_i32_1 = arith.constant 0 : i32
    return %2, %c0_i32_0 : i32, i32
  }
  func.func @transform_1(%arg0: i32, %arg1: i32) -> (i32, i32) {
    %c0_i32 = arith.constant 0 : i32
    %c0_i32_0 = arith.constant 0 : i32
    return %arg0, %c0_i32 : i32, i32
  }
}

</mosaic_0001>

<bundles_post_ra>
// kernel: tpu_custom_call.1
= control target key start
LH: loop header
LB: loop body
LE: loop exit
PB: predicated region body
PF: predicated region fallthrough
CT: control target
= control target key end

     0   :  { %6 = vsyncpa [#allocation3], 0  ;;  %s715_s0 = inlined_call_operand.hbm [shape: f32[16,128], index: 0, kind: input, shape index: {}]   ;;  %s716_s1 = inlined_call_operand.hbm [shape: f32[16,128], index: 1, kind: output, shape index: {}]  }
   0x1   :  { %8 = vsyncpa [#allocation3 + $0x1], 0 }
   0x2   :  { %9 = vsyncpa [#allocation4], 0 }
   0x3   :  { %11 = vsyncpa [#allocation4 + $0x1], 0  ;;  %s558_s6 = smov 0   ;;  %s560_s7 = smov 0  }
   0x4   :  { %s562_s8 = smov 0   ;;  %s564_s9 = smov 0  }
   0x5   :  { %s566_s10 = smov 0   ;;  %s568_s11 = smov 0  }
   0x6   :  { %s570_s12 = smov 0   ;;  %s572_s13 = smov 0  }
   0x7 LB: > { %s299_s14 = sadd.s32 4294967295, %s542_s13   ;;  %s300_s15 = sadd.s32 4294967294, %s542_s13   ;;  %s542_s13 = sphi %s572_s13, %s17_s13   ;;  %s538_s12 = sphi %s570_s12, %s727_s12   ;;  %s534_s11 = sphi %s568_s11, %s726_s11   ;;  %s530_s10 = sphi %s566_s10, %s705_s10   ;;  %s526_s9 = sphi %s564_s9, %s725_s9   ;;  %s522_s8 = sphi %s562_s8, %s724_s8   ;;  %s518_s7 = sphi %s560_s7, %s723_s7   ;;  %s514_s6 = sphi %s558_s6, %s722_s6  }
   0x8   : > { %s29_s16 = sadd.s32 1, %s538_s12  ;;  %p511_p1 = scmp.ne.s32.totalorder %s530_s10, 0 }
   0x9   : > { %p31_p0 = scmp.ge.s32.totalorder %s29_s16, 2  ;;  %p50_p2 = scmp.eq.s32.totalorder %s542_s13, 0 }
   0xa   : > { %p55_p3 = scmp.ne.s32.totalorder %s530_s10, %s526_s9  ;;  %p56_p5 = scmp.eq.s32.totalorder %s299_s14, 0 }
   0xb   : > { %s729_s16 = smov (%p31_p0, %s29_s16), 0  ;;  %p604_p4 = por %p511_p1, %p50_p2 }
   0xc   : > { %p608_p6 = por %p56_p5, %p55_p3  ;;  %s65_s19 = ssub.s32 %s538_s12, %s729_s16 }
   0xd   : > { %p66_p7 = scmp.eq.s32.totalorder %s65_s19, 0  ;;  %s68_s20 = sadd.s32 1, %s522_s8 }
   0xe   : > { %p78_p8 = scmp.ne.s32.totalorder %s522_s8, %s518_s7  ;;  %p79_p9 = scmp.eq.s32.totalorder %s299_s14, 1 }
   0xf   : > { %s616_s21 = scalar_select %p66_p7, %s522_s8, %s68_s20  }
  0x10   : > { %p84_p10 = scmp.ne.s32.totalorder %s518_s7, %s514_s6  ;;  %p85_p11 = scmp.eq.s32.totalorder %s300_s15, 1 }
  0x11   : > { %p622_p12 = por %p79_p9, %p78_p8  ;;  %p302_p13 = scmp.ge.s32.totalorder %s542_s13, 2 }
  0x12   : > { %p627_p0 = por %p85_p11, %p84_p10  ;;  %p332_p1 = scmp.lt.s32.totalorder %s542_s13, 2 }
  0x13   : > { %s118_s26 = sshll.u32 %s715_s0, 4  ;;  %s544_s27 = smov [#allocation2]   ;;  %s119_s26 = int_to_ptr.hbm [resolvable:$true] %s118_s26 }
  0x14   : > { %s120_s28 = sshll.u32 %s544_s27, 4  ;;  %p637_p2 = pnand %p332_p1, %p604_p4  ;;  %s121_s28 = int_to_ptr.vmem [resolvable:$true] %s120_s28 }
  0x15   : > { %p306_p3 = scmp.ge.s32.totalorder %s542_s13, 1  ;;  %p128_p5 = scmp.lt.s32.totalorder %s542_s13, 3 }
  0x16   : > { %s409_s30 = sshra.s32 %s119_s26, 4  ;;  %p413_p8 = pneg %p637_p2  ;;  %s410_s30 = int_to_ptr.hbm [resolvable:$true] %s409_s30 }
  0x17   : > { %s411_s2 = scalar_lea.hbm %s410_s30, 16  ;;  %s416_s5 = scalar_lea.hbm %s715_s0, 16 }
  0x18   : > { %p412_p7 = scmp.ne.s32.totalorder %s410_s30, %s411_s2  ;;  %p418_p11 = scmp.lt.s32.totalorder %s416_s5, %s411_s2 }
  0x1a   : > { %p414_p9 = pnand %p413_p8, %p412_p7 }
  0x1c   : > { %p415_p10 = pneg %p414_p9 }
  0x1e   : > { %p420_p4 = pnand %p418_p11, %p415_p10 }
  0x20   : > { %423 = shalt.err (!%p420_p4)
}
  0x21   : > { %s545_s9 = smov 128   ;;  %s546_s14 = smov 8  }
  0x22   : > { %327 = dma.hbm_to_vmem [thread:$0]  (!%p637_p2), %s119_s26, 256, %s121_s28, [#allocation3], %s545_s9, %s545_s9, %s546_s14  }
  0x23   : > { %p129_p1 = pnand %p306_p3, %p128_p5 }
  0x24   : > { %s134_s15 = sand.u32 (!%p129_p1), 1, %s530_s10  }
  0x25   : > { %132 = sbr.rel (%p129_p1) target bundleno = 95 (0x5f), region = 24  ;;  %s307_s17 = sshll.u32 (!%p129_p1), %s134_s15, 4 }
  0x26   : > { %s135_s19 = scalar_lea.sflag (!%p129_p1), [#allocation3], %s134_s15  ;;  %s138_s20 = scalar_lea.vmem (!%p129_p1), [#allocation2], %s307_s17 }
  0x2a   : > { %504 = dma.done.wait (%p608_p6), %s135_s19, 256  }
  0x2b   : > { %506 = vsyncadd (%p608_p6), %s135_s19, 4294967040  ;;  %s155_s24 = sand.u32 1, %s518_s7   ;;  %s318_s25 = sshll.u32 %s534_s11, 4  ;;  %v547_v0 = vmov 0.0  }
  0x2c   : > { %s308_s26 = sshll.u32 %s155_s24, 3  ;;  %s319_s27 = sadd.s32 16, %s318_s25 }
  0x2d   : > { %s663_s28 = scalar_lea.vmem [#allocation5], %s308_s26  ;;  %p310_p2 = scmp.gt.s32.totalorder %s319_s27, 16 }
  0x2e   : > { %166 = vst [vmem:[%s663_s28] sm:$0xff] %v547_v0 }
  0x2f   : > { %174 = sbr.rel (%p310_p2) target bundleno = 58 (0x3a), region = 36 }
  0x34   : > { %v175_v1 = vld [vmem:[%s138_s20] sm:$0xff]  ;;  %v176_v2 = vld [vmem:[%s138_s20 + $0x8] sm:$0xff] }
  0x35   : > { %v177_v3 = vld [vmem:[%s663_s28] sm:$0xff]  ;;  %v178_v4 = vadd.f32 %v176_v2, %v175_v1 }
  0x37   : > { %v179_v5 = vadd.f32 %v178_v4, %v177_v3 }
  0x39   : > { %180 = vst [vmem:[%s663_s28] sm:$0xff] %v179_v5 }
  0x3a PF: > { %p311_p6 = scmp.le.s32.totalorder %s319_s27, 16 }
  0x3c   : > { %183 = sbr.rel (%p311_p6) target bundleno = 80 (0x50), region = 40 }
  0x41   : > { %v187_v6 = vlaneseq  ;;  %v190_v7 = vstv %s318_s25  ;;  %v184_v9 = vld [vmem:[%s138_s20] sm:$0xff]  ;;  %v185_v12 = vld [vmem:[%s138_s20 + $0x8] sm:$0xff] }
  0x42   : > { %v201_v16 = vld [vmem:[%s663_s28] sm:$0xff] }
  0x43   : > { %v188_v8 = vshrl.u32 %v187_v6, 7 }
  0x45   : > { %v189_v10 = vadd.s32 8, %v188_v8  ;;  %v191_v11 = vadd.s32 %v190_v7, %v188_v8 }
  0x47   : > { %v192_v13 = vadd.s32 %v190_v7, %v189_v10  ;;  %vm193_vm0 = vcmp.lt.s32.totalorder %v191_v11, 16 }
  0x48   : > { %v199_v14 = vsel %vm193_vm0, %v184_v9, 0.0 }
  0x49   : > { %vm194_vm1 = vcmp.lt.s32.totalorder %v192_v13, 16 }
  0x4a   : > { %v200_v15 = vsel %vm194_vm1, %v185_v12, 0.0 }
  0x4b   : > { %v202_v17 = vadd.f32 %v200_v15, %v199_v14 }
  0x4d   : > { %v203_v18 = vadd.f32 %v202_v17, %v201_v16 }
  0x4f   : > { %204 = vst [vmem:[%s663_s28] sm:$0xff] %v203_v18 }
  0x50 PF: > { %s314_s18 = sshll.u32 %s534_s11, 3  ;;  %s218_s3 = sshll.u32 %s663_s28, 4  ;;  %s219_s3 = int_to_ptr.vmem [resolvable:$true] %s218_s3 }
  0x51   : > { %s216_s2 = scalar_lea.hbm %s716_s1, %s314_s18  ;;  %s206_s5 = scalar_lea.sflag [#allocation4], %s155_s24 }
  0x52   : > { %s220_s4 = sshll.u32 %s216_s2, 4  ;;  %s459_s11 = scalar_lea.hbm %s716_s1, 16  ;;  %s221_s4 = int_to_ptr.hbm [resolvable:$true] %s220_s4 }
  0x53   : > { %s453_s9 = sshra.s32 %s221_s4, 4  ;;  %s454_s9 = int_to_ptr.hbm [resolvable:$true] %s453_s9 }
  0x54   : > { %s455_s14 = scalar_lea.hbm %s454_s9, 8  ;;  %p460_p8 = scmp.lt.s32.totalorder %s454_s9, %s716_s1 }
  0x55   : > { %p456_p3 = scmp.ne.s32.totalorder %s454_s9, %s455_s14  ;;  %p461_p9 = scmp.lt.s32.totalorder %s459_s11, %s455_s14 }
  0x57   : > { %p457_p5 = pnand %p456_p3, %p622_p12  ;;  %p462_p10 = por %p461_p9, %p460_p8 }
  0x59   : > { %p458_p7 = pneg %p457_p5 }
  0x5b   : > { %p463_p11 = pnand %p462_p10, %p458_p7 }
  0x5d   : > { %466 = shalt.err (!%p463_p11)
}
  0x5e   : > { %322 = dma.vmem_to_hbm [thread:$0]  (%p622_p12), %s219_s3, 128, %s221_s4, %s206_s5  }
  0x5f PF: > { %s232_s24 = sand.u32 1, %s514_s6   ;;  %p329_p4 = pnand %p302_p13, %p627_p0 }
  0x60   : > { %s233_s25 = scalar_lea.sflag [#allocation4], %s232_s24 }
  0x61   : > { %p330_p1 = pneg %p329_p4 }
  0x63   : > { %508 = dma.done.wait (%p330_p1), %s233_s25, 128  }
  0x64   : > { %510 = vsyncadd (%p330_p1), %s233_s25, 4294967168  ;;  %s17_s13 = sadd.s32 1, %s542_s13   ;;  %s722_s6 = smov %s518_s7 }
  0x65   : > { %p14_p2 = scmp.ge.s32.totalorder %s17_s13, 4   ;;  %s723_s7 = smov %s522_s8 }
  0x66   : > { %s724_s8 = smov %s616_s21  ;;  %s725_s9 = smov %s530_s10 }
  0x67   : > { %s705_s10 = smov 0   ;;  %s726_s11 = smov %s538_s12 }
  0x68   : > { %s727_s12 = smov %s729_s16  ;;  %16 = sbr.rel (!%p14_p2) target bundleno = 7 (0x7), region = 81 }
  0x6d   :  { %239 = vsyncpa [#allocation3], 1 }
  0x6e   :  { %241 = vsyncpa [#allocation3 + $0x1], 1 }
  0x6f   :  { %242 = vsyncpa [#allocation4], 1 }
  0x70   :  { %244 = vsyncpa [#allocation4 + $0x1], 1 }

</bundles_post_ra>
